<compile_context>
chip_gen: v7x
topology: tpu7x:2x2x1
jax: 0.10.0
libtpu: 0.0.40
codegen_flags: <defaults>
</compile_context>

<pallas_src>
import functools

import jax
import jax.numpy as jnp
from jax import lax
from jax.experimental import pallas as pl
from jax.experimental.pallas import tpu as pltpu

_NEG = -1e30  # large finite negative (argmax-safe, no NaN risk vs -inf)


def _round_up(x, m):
    return ((x + m - 1) // m) * m


def _token_tiling(n):
    """Token tile size (multiple of 8) and padded token count."""
    if n >= 2048:
        tn = 512
    elif n >= 512:
        tn = 256
    else:
        tn = _round_up(n, 8)
    return _round_up(n, tn), tn


def _row_argmax(scores):
    """First index of the row max (matches torch.max), as [rows, 1] int32."""
    col = lax.broadcasted_iota(jnp.int32, scores.shape, 1)
    mx = jnp.max(scores, axis=-1, keepdims=True)
    return jnp.min(jnp.where(scores >= mx, col, jnp.int32(2 ** 30)),
                   axis=-1, keepdims=True)


# ---------------------------------------------------------------------------
# Kernel 1: fused Linear + LeakyReLU(0.1) for ALL 12 MLP heads (dropout = id)
#   x:[TN, D] @ w:[D, F] + b  with F = 2*hsel + 2*n_labels*rel (lane-dense)
# ---------------------------------------------------------------------------
def _proj_lrelu_kernel(x_ref, w_ref, b_ref, o_ref):
    y = jnp.dot(x_ref[...], w_ref[...], preferred_element_type=jnp.float32)
    y = y + b_ref[...]
    o_ref[...] = jnp.where(y > 0, y, 0.1 * y)


def fused_linear_leaky_relu(x, w, b, tn):
    n_pad, d = x.shape
    f = w.shape[1]
    return pl.pallas_call(
        _proj_lrelu_kernel,
        out_shape=jax.ShapeDtypeStruct((n_pad, f), jnp.float32),
        grid=(n_pad // tn,),
        in_specs=[
            pl.BlockSpec((tn, d), lambda i: (i, 0)),
            pl.BlockSpec((d, f), lambda i: (0, 0)),
            pl.BlockSpec((1, f), lambda i: (0, 0)),
        ],
        out_specs=pl.BlockSpec((tn, f), lambda i: (i, 0)),
        compiler_params=pltpu.CompilerParams(dimension_semantics=("parallel",)),
    )(x, w, b)


# ---------------------------------------------------------------------------
# Kernel 2: head-selection attention + mask + argmax (per batch, query tile)
#   Augmented bilinear decomposed: only the j-varying terms matter for argmax:
#     scores[i,j] = (d_i @ W11 + w21) . h_j      (w12/w22/bias are row-constant)
#   Mask built in-kernel from mask_h [B,1,S]; output is argmax+1, int32 [B,S,1].
# ---------------------------------------------------------------------------
def _hsel_argmax_kernel(d_ref, h_ref, w11_ref, w21_ref, mh_ref, o_ref):
    d = d_ref[0]                                                  # [TQ, H]
    h = h_ref[0]                                                  # [S,  H]
    t = jnp.dot(d, w11_ref[...], preferred_element_type=jnp.float32) + w21_ref[...]
    scores = lax.dot_general(t, h, (((1,), (1,)), ((), ())),
                             preferred_element_type=jnp.float32)  # [TQ, S]
    scores = jnp.where(mh_ref[0] > 0, scores, _NEG)               # head (column) mask
    o_ref[0] = (_row_argmax(scores) + 1).astype(jnp.int32)


def hsel_argmax(d3, h3, w11, w21, mh3, tq):
    B, S, H = d3.shape
    return pl.pallas_call(
        _hsel_argmax_kernel,
        out_shape=jax.ShapeDtypeStruct((B, S, 1), jnp.int32),
        grid=(B, S // tq),
        in_specs=[
            pl.BlockSpec((1, tq, H), lambda b, q: (b, q, 0)),
            pl.BlockSpec((1, S, H), lambda b, q: (b, 0, 0)),
            pl.BlockSpec((H, H), lambda b, q: (0, 0)),
            pl.BlockSpec((1, H), lambda b, q: (0, 0)),
            pl.BlockSpec((1, 1, S), lambda b, q: (b, 0, 0)),
        ],
        out_specs=pl.BlockSpec((1, tq, 1), lambda b, q: (b, q, 0)),
        compiler_params=pltpu.CompilerParams(
            dimension_semantics=("parallel", "parallel")),
    )(d3, h3, w11, w21, mh3)


# ---------------------------------------------------------------------------
# Kernel 3: label bilinear + bias terms + argmax, batched over ALL labels
#   grid = (label, token-tile). Bilinear is ONE [TN,R]@[R,L_max*R] matmul
#   (L_max*R = 128 lanes), per-label R-chunk reduce via a tiny indicator matmul
#   (avoids an in-kernel lane reshape); wx/wy fused as [h|d] @ wxy. Padded label
#   slots carry a -1e30 bias so they never win the argmax.
# ---------------------------------------------------------------------------
def _label_argmax_kernel(d_ref, h_ref, w_ref, wxy_ref, b_ref, o_ref):
    d = d_ref[0]                                                   # [TN, R]
    h = h_ref[0]                                                   # [TN, R]
    r = d.shape[1]
    lr = w_ref.shape[2]
    lm = lr // r
    t = jnp.dot(d, w_ref[0], preferred_element_type=jnp.float32)   # [TN, Lm*R]
    h_rep = jnp.concatenate([h] * lm, axis=-1)                     # [TN, Lm*R]
    rows = lax.broadcasted_iota(jnp.int32, (lr, lm), 0)
    cols = lax.broadcasted_iota(jnp.int32, (lr, lm), 1)
    sel = ((rows >= cols * r) & (rows < (cols + 1) * r)).astype(jnp.float32)
    bil = jnp.dot(t * h_rep, sel, preferred_element_type=jnp.float32)   # [TN, Lm]
    dh = jnp.concatenate([h, d], axis=-1)                               # [TN, 2R]
    lin = jnp.dot(dh, wxy_ref[0], preferred_element_type=jnp.float32)   # [TN, Lm]
    scores = bil + lin + b_ref[0]
    o_ref[0] = _row_argmax(scores)


def label_bilinear_argmax(deps_s, heads_s, w_flat, wxy, b, tn):
    G, n_pad, R = deps_s.shape
    LR = w_flat.shape[2]
    Lm = wxy.shape[2]
    return pl.pallas_call(
        _label_argmax_kernel,
        out_shape=jax.ShapeDtypeStruct((G, n_pad, 1), jnp.int32),
        grid=(G, n_pad // tn),
        in_specs=[
            pl.BlockSpec((1, tn, R), lambda g, i: (g, i, 0)),
            pl.BlockSpec((1, tn, R), lambda g, i: (g, i, 0)),
            pl.BlockSpec((1, R, LR), lambda g, i: (g, 0, 0)),
            pl.BlockSpec((1, 2 * R, Lm), lambda g, i: (g, 0, 0)),
            pl.BlockSpec((1, 1, Lm), lambda g, i: (g, 0, 0)),
        ],
        out_specs=pl.BlockSpec((1, tn, 1), lambda g, i: (g, i, 0)),
        compiler_params=pltpu.CompilerParams(
            dimension_semantics=("parallel", "parallel")),
    )(deps_s, heads_s, w_flat, wxy, b)


# ---------------------------------------------------------------------------
# Parameter init (deterministic, synthetic) and forward pass (glue in JAX)
# ---------------------------------------------------------------------------
def init_params(key, bilstm_dims, hsel_dims, rel_dims, label_sizes):
    params = {}

    def nxt():
        nonlocal key
        key, sub = jax.random.split(key)
        return sub

    def lin(din, dout):
        w = 0.1 * jax.random.normal(nxt(), (din, dout), jnp.float32)
        b = 0.1 * jax.random.normal(nxt(), (dout,), jnp.float32)
        return w, b

    params['hsel_head_w'], params['hsel_head_b'] = lin(bilstm_dims, hsel_dims)
    params['hsel_dep_w'], params['hsel_dep_b'] = lin(bilstm_dims, hsel_dims)
    params['hsel_W'] = 0.1 * jax.random.normal(
        nxt(), (hsel_dims + 1, hsel_dims + 1), jnp.float32)
    params['hsel_bias'] = jnp.zeros((1, 1), jnp.float32)  # argmax-invariant (unused)

    for name, L in label_sizes.items():
        params[f'{name}_head_w'], params[f'{name}_head_b'] = lin(bilstm_dims, rel_dims)
        params[f'{name}_dep_w'], params[f'{name}_dep_b'] = lin(bilstm_dims, rel_dims)
        params[f'{name}_W'] = 0.1 * jax.random.normal(
            nxt(), (L, rel_dims, rel_dims), jnp.float32)
        params[f'{name}_b'] = 0.1 * jax.random.normal(nxt(), (L,), jnp.float32)
        params[f'{name}_wx'] = 0.1 * jax.random.normal(nxt(), (rel_dims, L), jnp.float32)
        params[f'{name}_wy'] = 0.1 * jax.random.normal(nxt(), (rel_dims, L), jnp.float32)
    return params


def srl_dep_parser_forward(params, lstm_features, mask, mask_h, label_sizes):
    B, S, D = lstm_features.shape
    N = B * S
    names = list(label_sizes.keys())
    n_lab = len(names)
    H = params['hsel_head_w'].shape[1]
    R = params[f'{names[0]}_head_w'].shape[1]
    L_max = max(label_sizes.values())

    mask_i = mask.astype(jnp.int32)
    maskh_f = mask_h.astype(jnp.float32)

    N_pad, TN = _token_tiling(N)
    x = lstm_features.reshape(N, D)
    if N_pad > N:
        x = jnp.pad(x, ((0, N_pad - N), (0, 0)))

    # ---- one fused projection for all 12 MLP heads (dropout == identity) ----
    proj_ws = [params['hsel_head_w'], params['hsel_dep_w']]
    proj_bs = [params['hsel_head_b'], params['hsel_dep_b']]
    for name in names:
        proj_ws += [params[f'{name}_head_w'], params[f'{name}_dep_w']]
        proj_bs += [params[f'{name}_head_b'], params[f'{name}_dep_b']]
    w_all = jnp.concatenate(proj_ws, axis=1)                       # [D, F]
    b_all = jnp.concatenate(proj_bs, axis=0)[None, :]              # [1, F]
    proj = fused_linear_leaky_relu(x, w_all, b_all, TN)            # [N_pad, F]

    # ---- head selection ----
    hsel_heads = proj[:N, 0:H].reshape(B, S, H)
    hsel_deps = proj[:N, H:2 * H].reshape(B, S, H)
    W = params['hsel_W']
    w11 = W[:H, :H]
    w21 = W[H:H + 1, :H]
    # w12 / w22 / hsel_bias are constant along the argmax axis -> folded out.
    TQ = 256 if (S >= 512 and S % 256 == 0) else S
    tag_seq = hsel_argmax(hsel_deps, hsel_heads, w11, w21,
                          maskh_f.reshape(B, 1, S), TQ)[:, :, 0]   # argmax + 1
    # TODO(synk): parse_proj (Eisner projective decoding, sequential numpy DP) has
    # no clean Pallas equivalent; greedy per-token argmax heads are used instead.
    pred_head = mask_i * tag_seq
    # masked tokens have pred_head == 0 -> |0-1| = 1 gathers a valid-but-arbitrary
    # row; its label scores are discarded by the final mask multiply.
    head = jnp.abs(pred_head - 1)
    idx = (head + jnp.arange(B, dtype=jnp.int32)[:, None] * S).reshape(N)
    if N_pad > N:
        idx = jnp.concatenate([idx, jnp.zeros((N_pad - N,), jnp.int32)])

    # ---- label scorers: one fused kernel over (label, token-tile) ----
    lab = proj[:, 2 * H:].reshape(N_pad, n_lab, 2, R)
    heads_lab = lab[:, :, 0, :]                                    # [N_pad, n_lab, R]
    deps_lab = lab[:, :, 1, :]
    # TODO(synk): gather could be moved in-kernel with PrefetchScalarGridSpec; a
    # single fused jnp.take over all labels is used here (one pass, not five).
    heads_g = jnp.take(heads_lab, idx, axis=0)
    deps_s = jnp.transpose(deps_lab, (1, 0, 2))                    # [n_lab, N_pad, R]
    heads_s = jnp.transpose(heads_g, (1, 0, 2))

    w_list, wxy_list, b_list = [], [], []
    for name in names:
        Wl = params[f'{name}_W']                                   # [L, R, R]
        L = Wl.shape[0]
        wf = jnp.transpose(Wl, (1, 0, 2)).reshape(R, L * R)
        w_list.append(jnp.pad(wf, ((0, 0), (0, (L_max - L) * R))))
        wxy = jnp.concatenate([params[f'{name}_wx'], params[f'{name}_wy']], axis=0)
        wxy_list.append(jnp.pad(wxy, ((0, 0), (0, L_max - L))))
        b = jnp.concatenate([params[f'{name}_b'],
                             jnp.full((L_max - L,), _NEG, jnp.float32)])
        b_list.append(b[None, :])
    w_flat = jnp.stack(w_list)                                     # [n_lab, R, L_max*R]
    wxy_all = jnp.stack(wxy_list)                                  # [n_lab, 2R, L_max]
    b_lab = jnp.stack(b_list)                                      # [n_lab, 1, L_max]

    labs = label_bilinear_argmax(deps_s, heads_s, w_flat, wxy_all, b_lab, TN)

    preds = [pred_head]
    for i in range(n_lab):
        tag = labs[i, :N, 0].reshape(B, S)
        preds.append(mask_i * tag)
    return tuple(preds)


if __name__ == "__main__":
    B, S = 2, 8
    bilstm_dims, hsel_dims, rel_dims = 32, 16, 16
    label_sizes = {'rel': 8, 'srel': 6, 'srel_r': 4, 'srel_m': 5, 'srel_c': 7}

    key = jax.random.PRNGKey(0)
    kp, kf = jax.random.split(key)
    params = init_params(kp, bilstm_dims, hsel_dims, rel_dims, label_sizes)

    lstm_features = jax.random.normal(kf, (B, S, bilstm_dims), jnp.float32)
    lengths = jnp.array([8, 5], jnp.int32)
    mask = (jnp.arange(S)[None, :] < lengths[:, None]).astype(jnp.int32)   # [B, S]
    mask_h = mask.at[:, 0].set(1)                                          # [B, S]

    fwd = jax.jit(functools.partial(srl_dep_parser_forward, label_sizes=label_sizes))
    out = fwd(params, lstm_features, mask, mask_h)
    jax.block_until_ready(out)

    pred_head, pred_rel, pred_srel, pred_srel_r, pred_srel_m, pred_srel_c = out
    assert pred_head.shape == (B, S) and pred_rel.shape == (B, S)
    assert pred_srel.shape == (B, S) and pred_srel_c.shape == (B, S)
    print("KERNEL_OK")
</pallas_src>

<mosaic_0001>
module attributes {stable_mosaic.version = 11 : i64} {
  func.func @_proj_lrelu_kernel(%arg0: i32, %arg1: memref<16x32xf32, #tpu.memory_space<vmem>>, %arg2: memref<32x192xf32, #tpu.memory_space<vmem>>, %arg3: memref<1x192xf32, #tpu.memory_space<vmem>>, %arg4: memref<16x192xf32, #tpu.memory_space<vmem>>) attributes {dimension_semantics = [#tpu.dimension_semantics<parallel>], iteration_bounds = array<i64: 1>, scalar_prefetch = 0 : i64, scratch_operands = 0 : i64, tpu.core_type = #tpu.core_type<tc>, window_params = [{transform_indices = @transform_0, window_bounds = array<i64: 16, 32>}, {pipeline_mode = #tpu.pipeline_mode<synchronous>, transform_indices = @transform_1, window_bounds = array<i64: 32, 192>}, {pipeline_mode = #tpu.pipeline_mode<synchronous>, transform_indices = @transform_2, window_bounds = array<i64: 1, 192>}, {transform_indices = @transform_3, window_bounds = array<i64: 16, 192>}]} {
    %c0 = arith.constant 0 : index
    %c0_0 = arith.constant 0 : index
    %0 = vector.load %arg1[%c0, %c0_0] : memref<16x32xf32, #tpu.memory_space<vmem>>, vector<16x32xf32>
    %c0_1 = arith.constant 0 : index
    %c0_2 = arith.constant 0 : index
    %1 = vector.load %arg2[%c0_1, %c0_2] : memref<32x192xf32, #tpu.memory_space<vmem>>, vector<32x192xf32>
    %cst = arith.constant dense<0.000000e+00> : vector<16x192xf32>
    %2 = tpu.matmul %0, %1, %cst {dimension_numbers = #tpu.dot_dimension_numbers<[1], [0], [0], [1], [0, 0, 1, 1], [], []>} : vector<16x32xf32>, vector<32x192xf32>, vector<16x192xf32> -> vector<16x192xf32>
    %c0_3 = arith.constant 0 : index
    %c0_4 = arith.constant 0 : index
    %3 = vector.load %arg3[%c0_3, %c0_4] : memref<1x192xf32, #tpu.memory_space<vmem>>, vector<1x192xf32>
    %4 = vector.broadcast %3 : vector<1x192xf32> to vector<16x192xf32>
    %5 = arith.addf %2, %4 : vector<16x192xf32>
    %cst_5 = arith.constant 0.000000e+00 : f32
    %6 = vector.broadcast %cst_5 : f32 to vector<16x192xf32>
    %7 = arith.cmpf ogt, %5, %6 : vector<16x192xf32>
    %cst_6 = arith.constant 1.000000e-01 : f32
    %8 = vector.broadcast %cst_6 : f32 to vector<16x192xf32>
    %9 = arith.mulf %8, %5 : vector<16x192xf32>
    %10 = arith.select %7, %5, %9 : vector<16x192xi1>, vector<16x192xf32>
    %c0_7 = arith.constant 0 : index
    %c0_8 = arith.constant 0 : index
    %11 = vector.load %arg4[%c0_7, %c0_8] : memref<16x192xf32, #tpu.memory_space<vmem>>, vector<16x192xf32>
    tpu.vector_store %arg4[%c0_7, %c0_8], %10 {strides = array<i32>} : memref<16x192xf32, #tpu.memory_space<vmem>>, vector<16x192xf32>,
    return
  }
  func.func @transform_0(%arg0: i32) -> (i32, i32) {
    %c0_i32 = arith.constant 0 : i32
    %c0_i32_0 = arith.constant 0 : i32
    return %arg0, %c0_i32 : i32, i32
  }
  func.func @transform_1(%arg0: i32) -> (i32, i32) {
    %c0_i32 = arith.constant 0 : i32
    %c0_i32_0 = arith.constant 0 : i32
    %c0_i32_1 = arith.constant 0 : i32
    return %c0_i32, %c0_i32_0 : i32, i32
  }
  func.func @transform_2(%arg0: i32) -> (i32, i32) {
    %c0_i32 = arith.constant 0 : i32
    %c0_i32_0 = arith.constant 0 : i32
    %c0_i32_1 = arith.constant 0 : i32
    return %c0_i32, %c0_i32_0 : i32, i32
  }
  func.func @transform_3(%arg0: i32) -> (i32, i32) {
    %c0_i32 = arith.constant 0 : i32
    %c0_i32_0 = arith.constant 0 : i32
    return %arg0, %c0_i32 : i32, i32
  }
}

module attributes {stable_mosaic.version = 11 : i64} {
  func.func @_hsel_argmax_kernel(%arg0: i32, %arg1: i32, %arg2: memref<1x8x16xf32, #tpu.memory_space<vmem>>, %arg3: memref<1x8x16xf32, #tpu.memory_space<vmem>>, %arg4: memref<16x16xf32, #tpu.memory_space<vmem>>, %arg5: memref<1x16xf32, #tpu.memory_space<vmem>>, %arg6: memref<1x1x8xf32, #tpu.memory_space<vmem>>, %arg7: memref<1x8x1xi32, #tpu.memory_space<vmem>>) attributes {dimension_semantics = [#tpu.dimension_semantics<parallel>, #tpu.dimension_semantics<parallel>], iteration_bounds = array<i64: 2, 1>, scalar_prefetch = 0 : i64, scratch_operands = 0 : i64, tpu.core_type = #tpu.core_type<tc>, window_params = [{transform_indices = @transform_0, window_bounds = array<i64: 1, 8, 16>}, {transform_indices = @transform_1, window_bounds = array<i64: 1, 8, 16>}, {pipeline_mode = #tpu.pipeline_mode<synchronous>, transform_indices = @transform_2, window_bounds = array<i64: 16, 16>}, {pipeline_mode = #tpu.pipeline_mode<synchronous>, transform_indices = @transform_3, window_bounds = array<i64: 1, 16>}, {transform_indices = @transform_4, window_bounds = array<i64: 1, 1, 8>}, {transform_indices = @transform_5, window_bounds = array<i64: 1, 8, 1>}]} {
    %c0 = arith.constant 0 : index
    %c0_0 = arith.constant 0 : index
    %c0_1 = arith.constant 0 : index
    %0 = vector.load %arg2[%c0, %c0_0, %c0_1] : memref<1x8x16xf32, #tpu.memory_space<vmem>>, vector<1x8x16xf32>
    %1 = vector.shape_cast %0 : vector<1x8x16xf32> to vector<8x16xf32>
    %c0_2 = arith.constant 0 : index
    %c0_3 = arith.constant 0 : index
    %c0_4 = arith.constant 0 : index
    %2 = vector.load %arg3[%c0_2, %c0_3, %c0_4] : memref<1x8x16xf32, #tpu.memory_space<vmem>>, vector<1x8x16xf32>
    %3 = vector.shape_cast %2 : vector<1x8x16xf32> to vector<8x16xf32>
    %c0_5 = arith.constant 0 : index
    %c0_6 = arith.constant 0 : index
    %4 = vector.load %arg4[%c0_5, %c0_6] : memref<16x16xf32, #tpu.memory_space<vmem>>, vector<16x16xf32>
    %cst = arith.constant dense<0.000000e+00> : vector<8x16xf32>
    %5 = tpu.matmul %1, %4, %cst {dimension_numbers = #tpu.dot_dimension_numbers<[1], [0], [0], [1], [0, 0, 1, 1], [], []>} : vector<8x16xf32>, vector<16x16xf32>, vector<8x16xf32> -> vector<8x16xf32>
    %c0_7 = arith.constant 0 : index
    %c0_8 = arith.constant 0 : index
    %6 = vector.load %arg5[%c0_7, %c0_8] : memref<1x16xf32, #tpu.memory_space<vmem>>, vector<1x16xf32>
    %7 = vector.broadcast %6 : vector<1x16xf32> to vector<8x16xf32>
    %8 = arith.addf %5, %7 : vector<8x16xf32>
    %cst_9 = arith.constant dense<0.000000e+00> : vector<8x8xf32>
    %9 = tpu.matmul %8, %3, %cst_9 {dimension_numbers = #tpu.dot_dimension_numbers<[1], [1], [0], [0], [0, 0, 1, 0], [], []>} : vector<8x16xf32>, vector<8x16xf32>, vector<8x8xf32> -> vector<8x8xf32>
    %c0_10 = arith.constant 0 : index
    %c0_11 = arith.constant 0 : index
    %c0_12 = arith.constant 0 : index
    %10 = vector.load %arg6[%c0_10, %c0_11, %c0_12] : memref<1x1x8xf32, #tpu.memory_space<vmem>>, vector<1x1x8xf32>
    %11 = vector.shape_cast %10 : vector<1x1x8xf32> to vector<1x8xf32>
    %cst_13 = arith.constant 0.000000e+00 : f32
    %12 = vector.broadcast %cst_13 : f32 to vector<1x8xf32>
    %13 = arith.cmpf ogt, %11, %12 : vector<1x8xf32>
    %cst_14 = arith.constant -1.000000e+30 : f32
    %14 = vector.shape_cast %13 : vector<1x8xi1> to vector<1x8xi1>
    %15 = vector.broadcast %14 : vector<1x8xi1> to vector<8x8xi1>
    %16 = vector.broadcast %cst_14 : f32 to vector<8x8xf32>
    %17 = arith.select %15, %9, %16 : vector<8x8xi1>, vector<8x8xf32>
    %18 = tpu.iota {dimensions = array<i32: 1>} : vector<8x8xi32>
    %cst_15 = arith.constant dense<0xFF800000> : vector<8xf32>
    %19 = vector.multi_reduction <maximumf>, %17, %cst_15 [1] : vector<8x8xf32> to vector<8xf32>
    %20 = vector.shape_cast %19 : vector<8xf32> to vector<8x1xf32>
    %21 = vector.broadcast %20 : vector<8x1xf32> to vector<8x8xf32>
    %22 = arith.cmpf oge, %17, %21 : vector<8x8xf32>
    %c1073741824_i32 = arith.constant 1073741824 : i32
    %23 = vector.broadcast %c1073741824_i32 : i32 to vector<8x8xi32>
    %24 = arith.select %22, %18, %23 : vector<8x8xi1>, vector<8x8xi32>
    %cst_16 = arith.constant dense<2147483647> : vector<8xi32>
    %25 = vector.multi_reduction <minsi>, %24, %cst_16 [1] : vector<8x8xi32> to vector<8xi32>
    %26 = vector.shape_cast %25 : vector<8xi32> to vector<8x1xi32>
    %c1_i32 = arith.constant 1 : i32
    %27 = vector.broadcast %c1_i32 : i32 to vector<8x1xi32>
    %28 = arith.addi %26, %27 : vector<8x1xi32>
    %c0_17 = arith.constant 0 : index
    %c0_18 = arith.constant 0 : index
    %c0_19 = arith.constant 0 : index
    %29 = vector.load %arg7[%c0_17, %c0_18, %c0_19] : memref<1x8x1xi32, #tpu.memory_space<vmem>>, vector<1x8x1xi32>
    %30 = vector.shape_cast %29 : vector<1x8x1xi32> to vector<8x1xi32>
    %31 = vector.shape_cast %28 : vector<8x1xi32> to vector<1x8x1xi32>
    tpu.vector_store %arg7[%c0_17, %c0_18, %c0_19], %31 {strides = array<i32>} : memref<1x8x1xi32, #tpu.memory_space<vmem>>, vector<1x8x1xi32>,
    return
  }
  func.func @transform_0(%arg0: i32, %arg1: i32) -> (i32, i32, i32) {
    %c0_i32 = arith.constant 0 : i32
    %c0_i32_0 = arith.constant 0 : i32
    return %arg0, %arg1, %c0_i32 : i32, i32, i32
  }
  func.func @transform_1(%arg0: i32, %arg1: i32) -> (i32, i32, i32) {
    %c0_i32 = arith.constant 0 : i32
    %c0_i32_0 = arith.constant 0 : i32
    %c0_i32_1 = arith.constant 0 : i32
    return %arg0, %c0_i32, %c0_i32_0 : i32, i32, i32
  }
  func.func @transform_2(%arg0: i32, %arg1: i32) -> (i32, i32) {
    %c0_i32 = arith.constant 0 : i32
    %c0_i32_0 = arith.constant 0 : i32
    %c0_i32_1 = arith.constant 0 : i32
    return %c0_i32, %c0_i32_0 : i32, i32
  }
  func.func @transform_3(%arg0: i32, %arg1: i32) -> (i32, i32) {
    %c0_i32 = arith.constant 0 : i32
    %c0_i32_0 = arith.constant 0 : i32
    %c0_i32_1 = arith.constant 0 : i32
    return %c0_i32, %c0_i32_0 : i32, i32
  }
  func.func @transform_4(%arg0: i32, %arg1: i32) -> (i32, i32, i32) {
    %c0_i32 = arith.constant 0 : i32
    %c0_i32_0 = arith.constant 0 : i32
    %c0_i32_1 = arith.constant 0 : i32
    return %arg0, %c0_i32, %c0_i32_0 : i32, i32, i32
  }
  func.func @transform_5(%arg0: i32, %arg1: i32) -> (i32, i32, i32) {
    %c0_i32 = arith.constant 0 : i32
    %c0_i32_0 = arith.constant 0 : i32
    return %arg0, %arg1, %c0_i32 : i32, i32, i32
  }
}

module attributes {stable_mosaic.version = 11 : i64} {
  func.func @_label_argmax_kernel(%arg0: i32, %arg1: i32, %arg2: memref<1x16x16xf32, #tpu.memory_space<vmem>>, %arg3: memref<1x16x16xf32, #tpu.memory_space<vmem>>, %arg4: memref<1x16x128xf32, #tpu.memory_space<vmem>>, %arg5: memref<1x32x8xf32, #tpu.memory_space<vmem>>, %arg6: memref<1x1x8xf32, #tpu.memory_space<vmem>>, %arg7: memref<1x16x1xi32, #tpu.memory_space<vmem>>) attributes {dimension_semantics = [#tpu.dimension_semantics<parallel>, #tpu.dimension_semantics<parallel>], iteration_bounds = array<i64: 5, 1>, scalar_prefetch = 0 : i64, scratch_operands = 0 : i64, tpu.core_type = #tpu.core_type<tc>, window_params = [{transform_indices = @transform_0, window_bounds = array<i64: 1, 16, 16>}, {transform_indices = @transform_1, window_bounds = array<i64: 1, 16, 16>}, {transform_indices = @transform_2, window_bounds = array<i64: 1, 16, 128>}, {transform_indices = @transform_3, window_bounds = array<i64: 1, 32, 8>}, {transform_indices = @transform_4, window_bounds = array<i64: 1, 1, 8>}, {transform_indices = @transform_5, window_bounds = array<i64: 1, 16, 1>}]} {
    %c0 = arith.constant 0 : index
    %c0_0 = arith.constant 0 : index
    %c0_1 = arith.constant 0 : index
    %0 = vector.load %arg2[%c0, %c0_0, %c0_1] : memref<1x16x16xf32, #tpu.memory_space<vmem>>, vector<1x16x16xf32>
    %1 = vector.shape_cast %0 : vector<1x16x16xf32> to vector<16x16xf32>
    %c0_2 = arith.constant 0 : index
    %c0_3 = arith.constant 0 : index
    %c0_4 = arith.constant 0 : index
    %2 = vector.load %arg3[%c0_2, %c0_3, %c0_4] : memref<1x16x16xf32, #tpu.memory_space<vmem>>, vector<1x16x16xf32>
    %3 = vector.shape_cast %2 : vector<1x16x16xf32> to vector<16x16xf32>
    %c0_5 = arith.constant 0 : index
    %c0_6 = arith.constant 0 : index
    %c0_7 = arith.constant 0 : index
    %4 = vector.load %arg4[%c0_5, %c0_6, %c0_7] : memref<1x16x128xf32, #tpu.memory_space<vmem>>, vector<1x16x128xf32>
    %5 = vector.shape_cast %4 : vector<1x16x128xf32> to vector<16x128xf32>
    %cst = arith.constant dense<0.000000e+00> : vector<16x128xf32>
    %6 = tpu.matmul %1, %5, %cst {dimension_numbers = #tpu.dot_dimension_numbers<[1], [0], [0], [1], [0, 0, 1, 1], [], []>} : vector<16x16xf32>, vector<16x128xf32>, vector<16x128xf32> -> vector<16x128xf32>
    %7 = tpu.concatenate %3, %3, %3, %3, %3, %3, %3, %3 in 1 : vector<16x16xf32>, vector<16x16xf32>, vector<16x16xf32>, vector<16x16xf32>, vector<16x16xf32>, vector<16x16xf32>, vector<16x16xf32>, vector<16x16xf32> -> vector<16x128xf32>
    %8 = tpu.iota {dimensions = array<i32: 0>} : vector<128x8xi32>
    %9 = tpu.iota {dimensions = array<i32: 1>} : vector<128x8xi32>
    %c16_i32 = arith.constant 16 : i32
    %10 = vector.broadcast %c16_i32 : i32 to vector<128x8xi32>
    %11 = arith.muli %9, %10 : vector<128x8xi32>
    %12 = arith.cmpi sge, %8, %11 : vector<128x8xi32>
    %c1_i32 = arith.constant 1 : i32
    %13 = vector.broadcast %c1_i32 : i32 to vector<128x8xi32>
    %14 = arith.addi %9, %13 : vector<128x8xi32>
    %c16_i32_8 = arith.constant 16 : i32
    %15 = vector.broadcast %c16_i32_8 : i32 to vector<128x8xi32>
    %16 = arith.muli %14, %15 : vector<128x8xi32>
    %17 = arith.cmpi slt, %8, %16 : vector<128x8xi32>
    %18 = arith.andi %12, %17 : vector<128x8xi1>
    %19 = arith.extui %18 : vector<128x8xi1> to vector<128x8xi32>
    %20 = arith.sitofp %19 : vector<128x8xi32> to vector<128x8xf32>
    %21 = arith.mulf %6, %7 : vector<16x128xf32>
    %cst_9 = arith.constant dense<0.000000e+00> : vector<16x8xf32>
    %22 = tpu.matmul %21, %20, %cst_9 {dimension_numbers = #tpu.dot_dimension_numbers<[1], [0], [0], [1], [0, 0, 1, 1], [], []>} : vector<16x128xf32>, vector<128x8xf32>, vector<16x8xf32> -> vector<16x8xf32>
    %23 = tpu.concatenate %3, %1 in 1 : vector<16x16xf32>, vector<16x16xf32> -> vector<16x32xf32>
    %c0_10 = arith.constant 0 : index
    %c0_11 = arith.constant 0 : index
    %c0_12 = arith.constant 0 : index
    %24 = vector.load %arg5[%c0_10, %c0_11, %c0_12] : memref<1x32x8xf32, #tpu.memory_space<vmem>>, vector<1x32x8xf32>
    %25 = vector.shape_cast %24 : vector<1x32x8xf32> to vector<32x8xf32>
    %cst_13 = arith.constant dense<0.000000e+00> : vector<16x8xf32>
    %26 = tpu.matmul %23, %25, %cst_13 {dimension_numbers = #tpu.dot_dimension_numbers<[1], [0], [0], [1], [0, 0, 1, 1], [], []>} : vector<16x32xf32>, vector<32x8xf32>, vector<16x8xf32> -> vector<16x8xf32>
    %27 = arith.addf %22, %26 : vector<16x8xf32>
    %c0_14 = arith.constant 0 : index
    %c0_15 = arith.constant 0 : index
    %c0_16 = arith.constant 0 : index
    %28 = vector.load %arg6[%c0_14, %c0_15, %c0_16] : memref<1x1x8xf32, #tpu.memory_space<vmem>>, vector<1x1x8xf32>
    %29 = vector.shape_cast %28 : vector<1x1x8xf32> to vector<1x8xf32>
    %30 = vector.broadcast %29 : vector<1x8xf32> to vector<16x8xf32>
    %31 = arith.addf %27, %30 : vector<16x8xf32>
    %32 = tpu.iota {dimensions = array<i32: 1>} : vector<16x8xi32>
    %cst_17 = arith.constant dense<0xFF800000> : vector<16xf32>
    %33 = vector.multi_reduction <maximumf>, %31, %cst_17 [1] : vector<16x8xf32> to vector<16xf32>
    %34 = vector.shape_cast %33 : vector<16xf32> to vector<16x1xf32>
    %35 = vector.broadcast %34 : vector<16x1xf32> to vector<16x8xf32>
    %36 = arith.cmpf oge, %31, %35 : vector<16x8xf32>
    %c1073741824_i32 = arith.constant 1073741824 : i32
    %37 = vector.broadcast %c1073741824_i32 : i32 to vector<16x8xi32>
    %38 = arith.select %36, %32, %37 : vector<16x8xi1>, vector<16x8xi32>
    %cst_18 = arith.constant dense<2147483647> : vector<16xi32>
    %39 = vector.multi_reduction <minsi>, %38, %cst_18 [1] : vector<16x8xi32> to vector<16xi32>
    %40 = vector.shape_cast %39 : vector<16xi32> to vector<16x1xi32>
    %c0_19 = arith.constant 0 : index
    %c0_20 = arith.constant 0 : index
    %c0_21 = arith.constant 0 : index
    %41 = vector.load %arg7[%c0_19, %c0_20, %c0_21] : memref<1x16x1xi32, #tpu.memory_space<vmem>>, vector<1x16x1xi32>
    %42 = vector.shape_cast %41 : vector<1x16x1xi32> to vector<16x1xi32>
    %43 = vector.shape_cast %40 : vector<16x1xi32> to vector<1x16x1xi32>
    tpu.vector_store %arg7[%c0_19, %c0_20, %c0_21], %43 {strides = array<i32>} : memref<1x16x1xi32, #tpu.memory_space<vmem>>, vector<1x16x1xi32>,
    return
  }
  func.func @transform_0(%arg0: i32, %arg1: i32) -> (i32, i32, i32) {
    %c0_i32 = arith.constant 0 : i32
    %c0_i32_0 = arith.constant 0 : i32
    return %arg0, %arg1, %c0_i32 : i32, i32, i32
  }
  func.func @transform_1(%arg0: i32, %arg1: i32) -> (i32, i32, i32) {
    %c0_i32 = arith.constant 0 : i32
    %c0_i32_0 = arith.constant 0 : i32
    return %arg0, %arg1, %c0_i32 : i32, i32, i32
  }
  func.func @transform_2(%arg0: i32, %arg1: i32) -> (i32, i32, i32) {
    %c0_i32 = arith.constant 0 : i32
    %c0_i32_0 = arith.constant 0 : i32
    %c0_i32_1 = arith.constant 0 : i32
    return %arg0, %c0_i32, %c0_i32_0 : i32, i32, i32
  }
  func.func @transform_3(%arg0: i32, %arg1: i32) -> (i32, i32, i32) {
    %c0_i32 = arith.constant 0 : i32
    %c0_i32_0 = arith.constant 0 : i32
    %c0_i32_1 = arith.constant 0 : i32
    return %arg0, %c0_i32, %c0_i32_0 : i32, i32, i32
  }
  func.func @transform_4(%arg0: i32, %arg1: i32) -> (i32, i32, i32) {
    %c0_i32 = arith.constant 0 : i32
    %c0_i32_0 = arith.constant 0 : i32
    %c0_i32_1 = arith.constant 0 : i32
    return %arg0, %c0_i32, %c0_i32_0 : i32, i32, i32
  }
  func.func @transform_5(%arg0: i32, %arg1: i32) -> (i32, i32, i32) {
    %c0_i32 = arith.constant 0 : i32
    %c0_i32_0 = arith.constant 0 : i32
    return %arg0, %arg1, %c0_i32 : i32, i32, i32
  }
}

</mosaic_0001>

<bundles_post_ra>
// kernel: srl_dep_parser_forward.3
= control target key start
LH: loop header
LB: loop body
LE: loop exit
PB: predicated region body
PF: predicated region fallthrough
CT: control target
= control target key end

     0   :  { %v156_v3 = vmov 0.0   ;;  %vm36_vm0 = vcmask 261120   ;;  %v26_v15 = vlaneseq  ;;  %vm133_vm1 = vcmask 523264   ;;  %s224_s1 = inlined_call_operand.vmem [shape: f32[32,192], index: 1, kind: input, shape index: {}]   ;;  %s225_s0 = inlined_call_operand.vmem [shape: f32[16,32], index: 0, kind: input, shape index: {}]   ;;  %s226_s2 = inlined_call_operand.vmem [shape: f32[1,192], index: 2, kind: input, shape index: {}]   ;;  %s227_s3 = inlined_call_operand.vmem [shape: f32[16,192], index: 3, kind: output, shape index: {}]  }
   0x1   :  { %v17_v0 = vld [vmem:[%s224_s1 + $0x8] sm:$0xff]  ;;  %v19_v1 = vld [vmem:[%s224_s1 + $0x18] sm:$0xff]  ;;  %v16_v2 = vld [vmem:[%s224_s1] sm:$0xff]  ;;  %107 = vmatprep.mubr.f32.mxu0 %v156_v3  ;;  %113 = vmatprep.mubr.f32.mxu1 %v156_v3 }
   0x2   :  { %v143_v4 = vpack.c.bf16 %v19_v1, %v17_v0  ;;  %v18_v5 = vld [vmem:[%s224_s1 + $0x10] sm:$0xff]  ;;  %v21_v6 = vld [vmem:[%s224_s1 + $0x28] sm:$0xff]  ;;  %v23_v7 = vld [vmem:[%s224_s1 + $0x38] sm:$0xff]  ;;  %v27_v16 = vshrl.u32 %v26_v15, 7 }
   0x3   :  { %v145_v8 = vpack.c.bf16 %v18_v5, %v16_v2  ;;  %v147_v9 = vpack.c.bf16 %v23_v7, %v21_v6  ;;  %v20_v10 = vld [vmem:[%s224_s1 + $0x20] sm:$0xff]  ;;  %v22_v11 = vld [vmem:[%s224_s1 + $0x30] sm:$0xff]  ;;  %v15_v14 = vld [vmem:[%s225_s0 + $0x8] sm:$0xff] }
   0x4   :  { %144 = vmatprep.subr.bf16.mxu0 %v143_v4  ;;  %151 = vmatprep.subr.bf16.mxu1 %v143_v4  ;;  %v149_v12 = vpack.c.bf16 %v22_v11, %v20_v10  ;;  %v14_v13 = vld [vmem:[%s225_s0] sm:$0xff]  ;;  %v28_v17 = vsub.s32 0, %v27_v16  ;;  %v32_v19 = vsub.s32 1, %v27_v16 }
   0x5   :  { %146 = vmatpush1.bf16.msra.mxu0 %v145_v8  ;;  %153 = vmatpush1.bf16.msra.mxu1 %v145_v8  ;;  %v24_v18 = vld [vmem:[%s226_s2] sm:$0x3] }
   0x6   :  { %148 = vmatprep.subr.bf16.mxu0 %v147_v9  ;;  %152 = vmatprep.subr.bf16.mxu1 %v147_v9  ;;  %v29_v20 = vrot.slane %v24_v18, %v28_v17  ;;  %v33_v21 = vrot.slane %v24_v18, %v32_v19 }
   0x9   :  { %150 = vmatpush1.bf16.msra.mxu0 %v149_v12  ;;  %154 = vmatpush1.bf16.msra.mxu1 %v149_v12 }
   0xc   :  { %141 = vmatmul.mubr.msk.f32.vlgmr.msra.gmra.mrb[0].mxu0 %vm36_vm0, %v14_v13  ;;  %142 = vmatmul.mubr.msk.f32.vlgmr.msra.gmra.mrb[0].mxu1 %vm36_vm0, %v15_v14 }
  0xdf   :  { %v109_v22 = vpop.f32.mrb[0].mxu0  ;;  %v115_v23 = vpop.f32.mrb[0].mxu1 }
  0xe0   :  { %v110_v24 = vadd.f32 %v109_v22, %v29_v20  ;;  %v116_v25 = vadd.f32 %v115_v23, %v29_v20  ;;  %v111_v26 = vpop.f32.mrb[1].mxu0  ;;  %v117_v27 = vpop.f32.mrb[1].mxu1 }
  0xe1   :  { %v112_v28 = vadd.f32 %v111_v26, %v33_v21  ;;  %v118_v29 = vadd.f32 %v117_v27, %v33_v21 }
  0xe2   :  { %vm120_vm2 = vcmp.gt.f32.partialorder %v110_v24, 0.0  ;;  %v124_v30 = vmul.f32 0.1, %v110_v24  ;;  %vm122_vm3 = vcmp.gt.f32.partialorder %v116_v25, 0.0  ;;  %v126_v31 = vmul.f32 0.1, %v116_v25 }
  0xe3   :  { %vm121_vm4 = vcmp.gt.f32.partialorder %v112_v28, 0.0  ;;  %v125_v32 = vmul.f32 0.1, %v112_v28  ;;  %vm123_vm5 = vcmp.gt.f32.partialorder %v118_v29, 0.0  ;;  %v127_v33 = vmul.f32 0.1, %v118_v29 }
  0xe4   :  { %v128_v34 = vsel %vm120_vm2, %v110_v24, %v124_v30  ;;  %v130_v35 = vsel %vm122_vm3, %v116_v25, %v126_v31 }
  0xe5   :  { %132 = vst [vmem:[%s227_s3] sm:$0xff] %v128_v34  ;;  %135 = vst [vmem:[%s227_s3 + $0x10] sm:$0xff] %v130_v35  ;;  %v129_v36 = vsel %vm121_vm4, %v112_v28, %v125_v32  ;;  %v131_v37 = vsel %vm123_vm5, %v118_v29, %v127_v33 }
  0xe6   :  { %134 = vst.msk [vmem:[%s227_s3 + $0x8] sm:$0xff] %vm133_vm1, %v129_v36  ;;  %136 = vst.msk [vmem:[%s227_s3 + $0x18] sm:$0xff] %vm133_vm1, %v131_v37 }

// kernel: srl_dep_parser_forward.4
= control target key start
LH: loop header
LB: loop body
LE: loop exit
PB: predicated region body
PF: predicated region fallthrough
CT: control target
= control target key end

     0   :  { %s693_s18 = smov 0   ;;  %s695_s19 = smov 0   ;;  %s746_s0 = inlined_call_operand.vmem [shape: f32[2,8,16], index: 0, kind: input, shape index: {}]   ;;  %s747_s1 = inlined_call_operand.vmem [shape: f32[2,8,16], index: 1, kind: input, shape index: {}]   ;;  %s748_s2 = inlined_call_operand.vmem [shape: f32[16,16], index: 2, kind: input, shape index: {}]   ;;  %s749_s3 = inlined_call_operand.vmem [shape: f32[1,16], index: 3, kind: input, shape index: {}]   ;;  %s750_s4 = inlined_call_operand.vmem [shape: f32[2,1,8], index: 4, kind: input, shape index: {}]   ;;  %s751_s5 = inlined_call_operand.vmem [shape: s32[2,8,1], index: 5, kind: output, shape index: {}]  }
   0x1   :  { %s697_s20 = smov 0  }
   0x2 LB: > { %s27_s21 = sadd.s32 1, %s653_s19  ;;  %p577_p0 = scmp.ge.s32.totalorder %s657_s20, 1  ;;  %s657_s20 = sphi %s697_s20, %s15_s20   ;;  %s653_s19 = sphi %s695_s19, %s753_s19   ;;  %s649_s18 = sphi %s693_s18, %s752_s18  }
   0x3   : > { %p29_p1 = scmp.ge.s32.totalorder %s27_s21, 2  ;;  %p222_p2 = scmp.lt.s32.totalorder %s657_s20, 3 }
   0x5   : > { %s755_s21 = smov (%p29_p1, %s27_s21), 0  ;;  %p223_p3 = pnand %p577_p0, %p222_p2 }
   0x6   : > { %v284_v0 = vld [vmem:[%s748_s2] sm:$0xff] (!%p223_p3)  ;;  %v285_v1 = vld [vmem:[%s748_s2 + $0x8] sm:$0xff] (!%p223_p3)  ;;  %p261_p4 = scmp.lt.s32.totalorder (!%p223_p3), %s649_s18, 1  ;;  %v659_v2 = vmov (!%p223_p3), 0.0|0.0   ;;  %vm660_vm0 = vmmov (!%p223_p3), 0   ;;  %v661_v4 = vmov (!%p223_p3), 0.0   ;;  %v446_v11 = vlaneseq (!%p223_p3) }
   0x7   : > { %226 = sbr.rel (%p223_p3) target bundleno = 888 (0x378), region = 40  ;;  %604 = vmatprep.subr.bf16.mxu0 (!%p223_p3), %v659_v2  ;;  %v605_v3 = vpack.c.bf16 (!%p223_p3), %v285_v1, %v284_v0  ;;  %596 = vmatprep.mubr.msk.f32.mxu0 (!%p223_p3), %vm660_vm0, %v661_v4  ;;  %vm293_vm1 = vcmask (!%p223_p3), 130048   ;;  %v581_v7 = vld [vmem:[%s749_s3] ss:$0 sm:$0xff] (!%p223_p3)  ;;  %v662_v15 = vmov (!%p223_p3), 0   ;;  %vm454_vm4 = vcmask (!%p223_p3), 64512  }
   0x8   : > { %599 = vmatprep.subr.mxu1 (!%p223_p3), %v661_v4  ;;  %601 = vmatprep.mubr.msk.f32.mxu1 (!%p223_p3), %vm660_vm0, %v661_v4  ;;  %v447_v13 = vshrl.u32 (!%p223_p3), %v446_v11, 7  ;;  %v453_v22 = vand.u32 (!%p223_p3), 127, %v446_v11  ;;  %vm476_vm7 = vcmask (!%p223_p3), 7168  }
   0x9   : > { %606 = vmatpush3.bf16.msra.mxu0 (!%p223_p3), %v605_v3 }
   0xa   : > { %v448_v14 = vsub.s32 (!%p223_p3), 0, %v447_v13 }
   0xe   : > { %s757_s18 = smov (!%p261_p4, %s649_s18), 1 }
   0xf   : > { %s717_s26 = sshll.u32 %s757_s18, 3  ;;  %s274_s12 = scalar_lea.vmem %s750_s4, %s757_s18 }
  0x10   : > { %s267_s29 = scalar_lea.vmem %s746_s0, %s717_s26  ;;  %s271_s7 = scalar_lea.vmem %s747_s1, %s717_s26  ;;  %v443_v12 = vld [vmem:[%s274_s12] sm:$0x1] }
  0x11   : > { %v282_v5 = vld [vmem:[%s267_s29] sm:$0xff]  ;;  %vm444_vm2 = vcmp.gt.f32.partialorder %v443_v12, 0.0  ;;  %s281_s15 = scalar_lea.vmem %s751_s5, %s717_s26 }
  0x12   : > { %597 = vmatmul.mubr.msk.f32.vlgmr.msra.gmra.mrb[0].mxu0 %vm293_vm1, %v282_v5  ;;  %v283_v6 = vld [vmem:[%s271_s7] sm:$0xff]  ;;  %v445_v16 = vsel %vm444_vm2, 1, %v662_v15 }
  0x13   : > { %600 = vmatpush3.xpose.msk.msra.mxu1 %vm293_vm1, %v283_v6  ;;  %v449_v17 = vrot.slane %v445_v16, %v448_v14 }
  0x15   : > { %vm450_vm3 = vcmp.eq.s32.totalorder %v449_v17, 1 }
  0xe5   : > { %v363_v8 = vpop.f32.mrb[0].mxu0 }
  0xe6   : > { %v364_v9 = vadd.f32 %v581_v7, %v363_v8  ;;  %v598_v10 = vpop.f32.mrb[1].mxu0 }
  0xe8   : > { %602 = vmatmul.mubr.msk.f32.vlgmr.msra.gmra.mrb[0].mxu1 %vm293_vm1, %v364_v9 }
 0x1bb   : > { %v439_v18 = vpop.f32.mrb[0].mxu1 }
 0x1bc   : > { %v451_v19 = vsel %vm450_vm3, %v439_v18, -1e+30  ;;  %v603_v20 = vpop.f32.mrb[1].mxu1 }
 0x1bd   : > { %v455_v21 = vsel %vm454_vm4, %v451_v19, -inf }
 0x1be   : > { %456 = vmax.xlane.f32.xlu0 %v455_v21 }
 0x24b   : > { %v457_v23 = vpop.xlane.xlu0 %456 }
 0x24c   : > { %vm458_vm5 = vcmp.ge.f32.partialorder %v451_v19, %v457_v23 }
 0x24d   : > { %v459_v24 = vsel %vm458_vm5, %v453_v22, 1073741824 }
 0x24e   : > { %v460_v25 = vsel %vm454_vm4, %v459_v24, 2147483647 }
 0x24f   : > { %v462_v26 = vshra.s32 %v460_v25, 16  ;;  %v461_v28 = vand.u32 65535, %v460_v25 }
 0x251   : > { %v464_v27 = vcvt.s32.f32 %v462_v26  ;;  %v463_v30 = vcvt.s32.f32 %v461_v28 }
 0x253   : > { %465 = vmin.xlane.f32.xlu0 %v464_v27 }
 0x2e0   : > { %v466_v29 = vpop.xlane.xlu0 %465 }
 0x2e1   : > { %vm467_vm6 = vcmp.eq.f32.partialorder %v464_v27, %v466_v29  ;;  %v472_v32 = vcvt.f32.s32 %v466_v29 }
 0x2e2   : > { %v468_v31 = vsel %vm467_vm6, %v463_v30, inf }
 0x2e3   : > { %469 = vmin.xlane.f32.xlu1 %v468_v31  ;;  %v473_v34 = vshll.u32 %v472_v32, 16 }
 0x370   : > { %v470_v33 = vpop.xlane.xlu1 %469 }
 0x371   : > { %v471_v35 = vcvt.f32.s32 %v470_v33 }
 0x373   : > { %v474_v36 = vadd.s32 %v473_v34, %v471_v35 }
 0x375   : > { %v475_v37 = vadd.s32 1, %v474_v36 }
 0x377   : > { %477 = vst.msk [vmem:[%s281_s15] sm:$0xff] %vm476_vm7, %v475_v37 }
 0x378 PF: > { %s15_s20 = sadd.s32 1, %s657_s20   ;;  %s752_s18 = smov %s653_s19 }
 0x379   : > { %p12_p5 = scmp.ge.s32.totalorder %s15_s20, 4   ;;  %s753_s19 = smov %s755_s21 }
 0x37b   :  { %14 = sbr.rel (!%p12_p5) target bundleno = 2 (0x2), region = 76 }

// kernel: squeeze.15
= control target key start
LH: loop header
LB: loop body
LE: loop exit
PB: predicated region body
PF: predicated region fallthrough
CT: control target
= control target key end

     0   :  { %vm7_vm0 = vcmask 64512   ;;  %s39_s0 = inlined_call_operand.vmem [shape: s32[16], index: 0, kind: input, shape index: {}]   ;;  %s40_s1 = inlined_call_operand.vmem [shape: s32[2,8], index: 1, kind: output, shape index: {}]  }
   0x1   :  { %v4_v0 = vld [vmem:[%s39_s0] sm:$0x1]  ;;  %s22_s0 = smov 120  }
   0x2   :  { %5 = vst [vmem:[#allocation1] sm:$0x1] %v4_v0 }
   0x9   :  { %v9_v1 = vld [vmem:[#allocation1] sm:$0x1]  }
   0xa   :  { %v6_v2 = vld [vmem:[#allocation1] sm:$0x1]   ;;  %10 = vrot.lane.b32.xlu0 %v9_v1, %s22_s0 }
   0xb   :  { %8 = vst.msk [vmem:[#allocation0] sm:$0x1] %vm7_vm0, %v6_v2  }
  0x7c   :  { %v11_v3 = vpop.permute.xlu0 %10  }
  0x7d   :  { %14 = vst.msk [vmem:[#allocation0 + $0x1] sm:$0x1] %vm7_vm0, %v11_v3  }
  0x84   :  { %v18_v4 = vld [vmem:[#allocation0] sm:$0x3] }
  0x85   :  { %20 = vst [vmem:[%s40_s1] sm:$0x3] %v18_v4 }

// kernel: srl_dep_parser_forward.5
= control target key start
LH: loop header
LB: loop body
LE: loop exit
PB: predicated region body
PF: predicated region fallthrough
CT: control target
= control target key end

     0   :  { %s1249_s18 = smov 0   ;;  %s1251_s19 = smov 0   ;;  %s1516_s0 = inlined_call_operand.vmem [shape: f32[5,16,16], index: 0, kind: input, shape index: {}]   ;;  %s1517_s1 = inlined_call_operand.vmem [shape: f32[5,16,16], index: 1, kind: input, shape index: {}]   ;;  %s1518_s2 = inlined_call_operand.vmem [shape: f32[5,16,128], index: 2, kind: input, shape index: {}]   ;;  %s1519_s3 = inlined_call_operand.vmem [shape: f32[5,32,8], index: 3, kind: input, shape index: {}]   ;;  %s1520_s4 = inlined_call_operand.vmem [shape: f32[5,1,8], index: 4, kind: input, shape index: {}]   ;;  %s1521_s5 = inlined_call_operand.vmem [shape: s32[5,16,1], index: 5, kind: output, shape index: {}]  }
   0x1   :  { %s1253_s20 = smov 0  }
   0x2 LB: > { %s27_s21 = sadd.s32 1, %s1205_s19  ;;  %p973_p0 = scmp.ge.s32.totalorder %s1209_s20, 1  ;;  %s1209_s20 = sphi %s1253_s20, %s15_s20   ;;  %s1205_s19 = sphi %s1251_s19, %s1545_s19   ;;  %s1201_s18 = sphi %s1249_s18, %s1544_s18  }
   0x3   : > { %p29_p1 = scmp.ge.s32.totalorder %s27_s21, 5  ;;  %p253_p2 = scmp.lt.s32.totalorder %s1209_s20, 6 }
   0x5   : > { %s1547_s21 = smov (%p29_p1, %s27_s21), 0  ;;  %p254_p3 = pnand %p973_p0, %p253_p2 }
   0x6   : > { %p312_p4 = scmp.lt.s32.totalorder (!%p254_p3), %s1201_s18, 4  ;;  %vm360_vm0 = vcmask (!%p254_p3), 130048   ;;  %s1211_s7 = smov (!%p254_p3), 16   ;;  %v506_v6 = vlaneseq (!%p254_p3)  ;;  %v1215_v24 = vmov (!%p254_p3), 1.0|1.0  }
   0x7   : > { %257 = sbr.rel (%p254_p3) target bundleno = 903 (0x387), region = 40  ;;  %s1212_s8 = smov (!%p254_p3), 32  }
   0x8   : > { %v1300_v8 = vshrl.u32 (!%p254_p3), %v506_v6, 7  ;;  %v1302_v9 = vand.u32 (!%p254_p3), 127, %v506_v6  ;;  %s1213_s9 = smov (!%p254_p3), 48   ;;  %s1214_s11 = smov (!%p254_p3), 64  }
   0x9   : > { %s1216_s15 = smov (!%p254_p3), 80   ;;  %s1217_s16 = smov (!%p254_p3), 96  }
   0xa   : > { %v508_v10 = vadd.s32 (!%p254_p3), 8, %v1300_v8  ;;  %v1308_v11 = vmul.u32 (!%p254_p3), 16, %v1302_v9  ;;  %v542_v12 = vadd.s32 (!%p254_p3), 1, %v1302_v9  ;;  %v509_v13 = vadd.s32 (!%p254_p3), 16, %v1300_v8  ;;  %s1218_s17 = smov (!%p254_p3), 112  }
   0xb   : > { %v510_v15 = vadd.s32 (!%p254_p3), 24, %v1300_v8  ;;  %v511_v16 = vadd.s32 (!%p254_p3), 32, %v1300_v8  ;;  %v512_v18 = vadd.s32 (!%p254_p3), 40, %v1300_v8  ;;  %v513_v22 = vadd.s32 (!%p254_p3), 48, %v1300_v8 }
   0xc   : > { %vm526_vm1 = vcmp.ge.s32.totalorder (!%p254_p3), %v1300_v8, %v1308_v11  ;;  %v1316_v14 = vmul.u32 (!%p254_p3), 16, %v542_v12  ;;  %vm527_vm2 = vcmp.ge.s32.totalorder (!%p254_p3), %v508_v10, %v1308_v11  ;;  %vm528_vm6 = vcmp.ge.s32.totalorder (!%p254_p3), %v509_v13, %v1308_v11 }
   0xd   : > { %vm529_vm9 = vcmp.ge.s32.totalorder (!%p254_p3), %v510_v15, %v1308_v11  ;;  %vm530_vm13 = vcmp.ge.s32.totalorder (!%p254_p3), %v511_v16, %v1308_v11  ;;  %v514_v26 = vadd.s32 (!%p254_p3), 56, %v1300_v8  ;;  %v515_v28 = vadd.s32 (!%p254_p3), 64, %v1300_v8 }
   0xe   : > { %s1549_s18 = smov (!%p312_p4, %s1201_s18), 4  ;;  %vm544_vm3 = vcmp.lt.s32.totalorder %v1300_v8, %v1316_v14  ;;  %vm545_vm4 = vcmp.lt.s32.totalorder %v508_v10, %v1316_v14  ;;  %vm546_vm7 = vcmp.lt.s32.totalorder %v509_v13, %v1316_v14  ;;  %vm547_vm10 = vcmp.lt.s32.totalorder %v510_v15, %v1316_v14 }
   0xf   : > { %s1270_s22 = sshll.u32 %s1549_s18, 4  ;;  %s1026_s10 = sshll.u32 %s1549_s18, 5  ;;  %vm1326_vm5 = vmand %vm526_vm1, %vm544_vm3  ;;  %vm548_vm14 = vcmp.lt.s32.totalorder %v511_v16, %v1316_v14  ;;  %vm531_vm1 = vcmp.ge.s32.totalorder %v512_v18, %v1308_v11  ;;  %v516_v30 = vadd.s32 72, %v1300_v8  ;;  %v517_v32 = vadd.s32 80, %v1300_v8 }
  0x10   : > { %s329_s25 = scalar_lea.vmem %s1517_s1, %s1270_s22  ;;  %s335_s28 = scalar_lea.vmem %s1518_s2, %s1270_s22  ;;  %vm1339_vm8 = vmand %vm527_vm2, %vm545_vm4  ;;  %vm549_vm2 = vcmp.lt.s32.totalorder %v512_v18, %v1316_v14  ;;  %v518_v34 = vadd.s32 88, %v1300_v8  ;;  %v519_v36 = vadd.s32 96, %v1300_v8  ;;  %v520_v38 = vadd.s32 104, %v1300_v8 }
  0x11   : > { %v1280_v0 = vld [vmem:[%s329_s25] sm:$0xff]  ;;  %s319_s6 = scalar_lea.vmem %s1516_s0, %s1270_s22  ;;  %v359_v2 = vld [vmem:[%s335_s28 + $0x8] sm:$0xff]  ;;  %s1336_s14 = scalar_lea.vmem %s1519_s3, %s1026_s10  ;;  %vm1121_vm11 = vmpackc.low %vm1339_vm8, %vm1326_vm5  ;;  %vm532_vm5 = vcmp.ge.s32.totalorder %v513_v22, %v1308_v11  ;;  %vm533_vm8 = vcmp.ge.s32.totalorder %v514_v26, %v1308_v11  ;;  %v521_v41 = vadd.s32 112, %v1300_v8  ;;  %v522_v42 = vadd.s32 120, %v1300_v8 }
  0x12   : > { %v358_v1 = vld [vmem:[%s335_s28] sm:$0xff]  ;;  %444 = vrot.lane.b32.xlu0 %v1280_v0, %s1211_s7  ;;  %v1290_v4 = vld [vmem:[%s329_s25 + $0x8] sm:$0xff]  ;;  %450 = vrot.lane.b32.xlu1 %v1280_v0, %s1212_s8  ;;  %vm1355_vm12 = vmand %vm528_vm6, %vm546_vm7  ;;  %vm550_vm6 = vcmp.lt.s32.totalorder %v513_v22, %v1316_v14  ;;  %s343_s25 = scalar_lea.vmem %s1520_s4, %s1549_s18  ;;  %s352_s27 = scalar_lea.vmem %s1521_s5, %s1270_s22 }
  0x13   : > { %v1286_v3 = vld [vmem:[%s319_s6] sm:$0xff]  ;;  %v1109_v5 = vpack.c.bf16 %v359_v2, %v358_v1  ;;  %v1295_v7 = vld [vmem:[%s319_s6 + $0x8] sm:$0xff]  ;;  %1122 = vmatprep.subr.msk.bf16.mxu1 %vm1121_vm11, %v1215_v24  ;;  %vm1368_vm15 = vmand %vm529_vm9, %vm547_vm10  ;;  %vm551_vm9 = vcmp.lt.s32.totalorder %v514_v26, %v1316_v14 }
  0x14   : > { %1060 = vmatprep.mubr.msk.f32.mxu0 %vm360_vm0, %v1286_v3  ;;  %v618_v20 = vld [vmem:[%s1336_s14] sm:$0xff]  ;;  %v619_v21 = vld [vmem:[%s1336_s14 + $0x8] sm:$0xff]  ;;  %1124 = vmatpush3.bf16.msk.msra.mxu1 %vm1121_vm11, %v1215_v24  ;;  %vm1125_vm3 = vmpackc.low %vm1368_vm15, %vm1355_vm12  ;;  %vm534_vm12 = vcmp.ge.s32.totalorder %v515_v28, %v1308_v11  ;;  %vm535_vm15 = vcmp.ge.s32.totalorder %v516_v30, %v1308_v11 }
  0x15   : > { %1110 = vmatprep.subr.bf16.mxu0 %v1109_v5  ;;  %v1113_v23 = vpack.c.bf16 %v619_v21, %v618_v20  ;;  %1126 = vmatprep.subr.msk.bf16.mxu1 %vm1125_vm3, %v1215_v24  ;;  %vm1381_vm4 = vmand %vm530_vm13, %vm548_vm14  ;;  %vm552_vm13 = vcmp.lt.s32.totalorder %v515_v28, %v1316_v14  ;;  %v620_v43 = vld [vmem:[%s1336_s14 + $0x10] sm:$0xff]  ;;  %v621_v44 = vld [vmem:[%s1336_s14 + $0x18] sm:$0xff] }
  0x16   : > { %1112 = vmatpush3.bf16.msra.mxu0 %v1109_v5  ;;  %446 = vrot.lane.b32.xlu0 %v1290_v4, %s1211_s7  ;;  %vm1388_vm7 = vmand %vm531_vm1, %vm549_vm2  ;;  %vm553_vm1 = vcmp.lt.s32.totalorder %v516_v30, %v1316_v14  ;;  %v1117_v45 = vpack.c.bf16 %v621_v44, %v620_v43 }
  0x17   : > { %452 = vrot.lane.b32.xlu1 %v1290_v4, %s1212_s8  ;;  %1114 = vmatprep.subr.bf16.mxu0 %v1113_v23  ;;  %vm1129_vm10 = vmpackc.low %vm1388_vm7, %vm1381_vm4  ;;  %vm536_vm4 = vcmp.ge.s32.totalorder %v517_v32, %v1308_v11  ;;  %vm537_vm7 = vcmp.ge.s32.totalorder %v518_v34, %v1308_v11 }
  0x18   : > { %1128 = vmatpush3.bf16.msk.msra.mxu1 %vm1125_vm3, %v1215_v24  ;;  %vm1405_vm11 = vmand %vm532_vm5, %vm550_vm6  ;;  %vm554_vm5 = vcmp.lt.s32.totalorder %v517_v32, %v1316_v14 }
  0x19   : > { %1061 = vmatmul.mubr.msk.f32.vlgmr.msra.gmra.mrb[0].mxu0 %vm360_vm0, %v1295_v7  ;;  %1130 = vmatprep.subr.msk.bf16.mxu1 %vm1129_vm10, %v1215_v24  ;;  %vm1412_vm14 = vmand %vm533_vm8, %vm551_vm9  ;;  %vm555_vm8 = vcmp.lt.s32.totalorder %v518_v34, %v1316_v14 }
  0x1a   : > { %456 = vrot.lane.b32.xlu0 %v1280_v0, %s1213_s9  ;;  %1116 = vmatpush3.bf16.msra.mxu0 %v1113_v23  ;;  %vm1133_vm2 = vmpackc.low %vm1412_vm14, %vm1405_vm11  ;;  %vm540_vm14 = vcmp.ge.s32.totalorder %v521_v41, %v1308_v11  ;;  %v1020_v23 = vld [vmem:[%s343_s25] ss:$0 sm:$0xff] }
  0x1b   : > { %458 = vrot.lane.b32.xlu1 %v1290_v4, %s1213_s9  ;;  %vm1425_vm3 = vmand %vm534_vm12, %vm552_vm13  ;;  %vm538_vm12 = vcmp.ge.s32.totalorder %v519_v36, %v1308_v11  ;;  %vm556_vm13 = vcmp.lt.s32.totalorder %v519_v36, %v1316_v14  ;;  %1118 = vmatprep.subr.bf16.mxu0 %v1117_v45 }
  0x1c   : > { %1132 = vmatpush3.bf16.msk.msra.mxu1 %vm1129_vm10, %v1215_v24  ;;  %vm1439_vm6 = vmand %vm535_vm15, %vm553_vm1  ;;  %vm539_vm1 = vcmp.ge.s32.totalorder %v520_v38, %v1308_v11 }
  0x1d   : > { %1134 = vmatprep.subr.msk.bf16.mxu1 %vm1133_vm2, %v1215_v24  ;;  %vm1137_vm9 = vmpackc.low %vm1439_vm6, %vm1425_vm3  ;;  %vm557_vm3 = vcmp.lt.s32.totalorder %v520_v38, %v1316_v14 }
  0x1e   : > { %462 = vrot.lane.b32.xlu0 %v1280_v0, %s1214_s11  ;;  %vm1449_vm10 = vmand %vm536_vm4, %vm554_vm5  ;;  %1120 = vmatpush3.bf16.msra.mxu0 %v1117_v45 }
  0x1f   : > { %464 = vrot.lane.b32.xlu1 %v1290_v4, %s1214_s11  ;;  %vm571_vm15 = vmand %vm537_vm7, %vm555_vm8  ;;  %vm558_vm7 = vcmp.lt.s32.totalorder %v521_v41, %v1316_v14  ;;  %vm559_vm8 = vcmp.lt.s32.totalorder %v522_v42, %v1316_v14 }
  0x20   : > { %1136 = vmatpush3.bf16.msk.msra.mxu1 %vm1133_vm2, %v1215_v24  ;;  %vm1141_vm4 = vmpackc.low %vm571_vm15, %vm1449_vm10  ;;  %vm541_vm2 = vcmp.ge.s32.totalorder %v522_v42, %v1308_v11  ;;  %vm491_vm15 = vcmask 392192  }
  0x21   : > { %1138 = vmatprep.subr.msk.bf16.mxu1 %vm1137_vm9, %v1215_v24  ;;  %vm572_vm5 = vmand %vm538_vm12, %vm556_vm13  ;;  %vm488_vm13 = vcmask 261120  }
  0x22   : > { %468 = vrot.lane.b32.xlu0 %v1280_v0, %s1216_s15  ;;  %vm573_vm6 = vmand %vm539_vm1, %vm557_vm3  ;;  %vm494_vm1 = vcmask 523264   ;;  %vm497_vm3 = vcmask 654336  }
  0x23   : > { %470 = vrot.lane.b32.xlu1 %v1290_v4, %s1216_s15  ;;  %vm1145_vm11 = vmpackc.low %vm573_vm6, %vm572_vm5  ;;  %vm503_vm5 = vcmask 916480  }
  0x24   : > { %1140 = vmatpush3.bf16.msk.msra.mxu1 %vm1137_vm9, %v1215_v24  ;;  %vm574_vm9 = vmand %vm540_vm14, %vm558_vm7  ;;  %vm828_vm7 = vcmask 7168  }
  0x25   : > { %1142 = vmatprep.subr.msk.bf16.mxu1 %vm1141_vm4, %v1215_v24  ;;  %vm575_vm10 = vmand %vm541_vm2, %vm559_vm8 }
  0x26   : > { %474 = vrot.lane.b32.xlu0 %v1280_v0, %s1217_s16  ;;  %vm1149_vm12 = vmpackc.low %vm575_vm10, %vm574_vm9 }
  0x27   : > { %476 = vrot.lane.b32.xlu1 %v1290_v4, %s1217_s16 }
  0x28   : > { %1144 = vmatpush3.bf16.msk.msra.mxu1 %vm1141_vm4, %v1215_v24  ;;  %vm500_vm4 = vcmask 785408  }
  0x29   : > { %1146 = vmatprep.subr.msk.bf16.mxu1 %vm1145_vm11, %v1215_v24 }
  0x2a   : > { %480 = vrot.lane.b32.xlu0 %v1280_v0, %s1218_s17 }
  0x2b   : > { %482 = vrot.lane.b32.xlu1 %v1290_v4, %s1218_s17 }
  0x2c   : > { %1148 = vmatpush3.bf16.msk.msra.mxu1 %vm1145_vm11, %v1215_v24 }
  0x2d   : > { %1150 = vmatprep.subr.msk.bf16.mxu1 %vm1149_vm12, %v1215_v24 }
  0x2e   : > { %610 = vrot.lane.b32.xlu0 %v1286_v3, %s1211_s7 }
  0x2f   : > { %612 = vrot.lane.b32.xlu1 %v1295_v7, %s1211_s7 }
  0x30   : > { %1152 = vmatpush3.bf16.msk.msra.mxu1 %vm1149_vm12, %v1215_v24 }
  0x84   : > { %v445_v46 = vpop.permute.xlu0 %444  ;;  %v451_v48 = vpop.permute.xlu1 %450 }
  0x85   : > { %v486_v47 = vsel %vm360_vm0, %v1280_v0, %v445_v46 }
  0x86   : > { %v489_v49 = vsel %vm488_vm13, %v486_v47, %v451_v48 }
  0x88   : > { %v447_v50 = vpop.permute.xlu0 %446 }
  0x89   : > { %v487_v51 = vsel %vm360_vm0, %v1290_v4, %v447_v50  ;;  %v453_v52 = vpop.permute.xlu1 %452 }
  0x8a   : > { %v490_v53 = vsel %vm488_vm13, %v487_v51, %v453_v52 }
  0x8c   : > { %v457_v54 = vpop.permute.xlu0 %456 }
  0x8d   : > { %v492_v55 = vsel %vm491_vm15, %v489_v49, %v457_v54  ;;  %v459_v56 = vpop.permute.xlu1 %458 }
  0x8e   : > { %v493_v57 = vsel %vm491_vm15, %v490_v53, %v459_v56 }
  0x90   : > { %v463_v58 = vpop.permute.xlu0 %462 }
  0x91   : > { %v495_v59 = vsel %vm494_vm1, %v492_v55, %v463_v58  ;;  %v465_v60 = vpop.permute.xlu1 %464 }
  0x92   : > { %v496_v61 = vsel %vm494_vm1, %v493_v57, %v465_v60 }
  0x94   : > { %v469_v62 = vpop.permute.xlu0 %468 }
  0x95   : > { %v498_v63 = vsel %vm497_vm3, %v495_v59, %v469_v62  ;;  %v471_v1 = vpop.permute.xlu1 %470 }
  0x96   : > { %v499_v2 = vsel %vm497_vm3, %v496_v61, %v471_v1 }
  0x98   : > { %v475_v3 = vpop.permute.xlu0 %474 }
  0x99   : > { %v501_v5 = vsel %vm500_vm4, %v498_v63, %v475_v3  ;;  %v477_v6 = vpop.permute.xlu1 %476 }
  0x9a   : > { %v502_v7 = vsel %vm500_vm4, %v499_v2, %v477_v6 }
  0x9c   : > { %v481_v8 = vpop.permute.xlu0 %480 }
  0x9d   : > { %v483_v10 = vpop.permute.xlu1 %482  ;;  %v504_v11 = vsel %vm503_vm5, %v501_v5, %v481_v8 }
  0x9e   : > { %v505_v12 = vsel %vm503_vm5, %v502_v7, %v483_v10 }
  0xa0   : > { %v611_v13 = vpop.permute.xlu0 %610 }
  0xa1   : > { %v616_v14 = vsel %vm360_vm0, %v1280_v0, %v611_v13  ;;  %v613_v15 = vpop.permute.xlu1 %612 }
  0xa2   : > { %v617_v16 = vsel %vm360_vm0, %v1290_v4, %v613_v15  ;;  %1071 = vmatprep.mubr.msk.f32.mxu0 %vm488_vm13, %v616_v14  ;;  %vm787_vm0 = vcmask 64512  }
  0xa3   : > { %1072 = vmatmul.mubr.msk.f32.vlgmr.msra.gmra.mrb[2].mxu0 %vm488_vm13, %v617_v16 }
  0xec   : > { %v1062_v17 = vpop.f32.mrb[0].mxu0 }
  0xed   : > { %v609_v18 = vmul.f32 %v1062_v17, %v505_v12  ;;  %v433_v19 = vpop.f32.mrb[1].mxu0 }
  0xee   : > { %v608_v20 = vmul.f32 %v504_v11, %v433_v19 }
  0xf0   : > { %1106 = vmatprep.mubr.f32.mxu1 %v608_v20 }
  0xf1   : > { %1107 = vmatmul.mubr.f32.vlgmr.msra.gmra.mrb[0].mxu1 %v609_v18 }
 0x176   : > { %v1073_v21 = vpop.f32.mrb[2].mxu0 }
 0x177   : > { %v694_v22 = vpop.f32.mrb[3].mxu0 }
 0x1c4   : > { %v1108_v0 = vpop.f32.mrb[0].mxu1 }
 0x1c5   : > { %v775_v24 = vadd.f32 %v1108_v0, %v1073_v21  ;;  %v769_v4 = vpop.f32.mrb[1].mxu1 }
 0x1c6   : > { %v770_v25 = vadd.f32 %v769_v4, %v694_v22 }
 0x1c7   : > { %v786_v26 = vadd.f32 %v1020_v23, %v775_v24 }
 0x1c8   : > { %v785_v27 = vadd.f32 %v1020_v23, %v770_v25 }
 0x1c9   : > { %v791_v28 = vsel %vm787_vm0, %v786_v26, -inf }
 0x1ca   : > { %792 = vmax.xlane.f32.xlu1 %v791_v28  ;;  %v788_v29 = vsel %vm787_vm0, %v785_v27, -inf }
 0x1cb   : > { %789 = vmax.xlane.f32.xlu0 %v788_v29 }
 0x257   : > { %v793_v30 = vpop.xlane.xlu1 %792 }
 0x258   : > { %vm795_vm6 = vcmp.ge.f32.partialorder %v786_v26, %v793_v30  ;;  %v790_v31 = vpop.xlane.xlu0 %789 }
 0x259   : > { %v797_v32 = vsel %vm795_vm6, %v1302_v9, 1073741824  ;;  %vm794_vm11 = vcmp.ge.f32.partialorder %v785_v27, %v790_v31 }
 0x25a   : > { %v796_v33 = vsel %vm794_vm11, %v1302_v9, 1073741824  ;;  %v813_v34 = vsel %vm787_vm0, %v797_v32, 2147483647 }
 0x25b   : > { %v798_v35 = vsel %vm787_vm0, %v796_v33, 2147483647  ;;  %v815_v38 = vshra.s32 %v813_v34, 16  ;;  %v814_v43 = vand.u32 65535, %v813_v34 }
 0x25c   : > { %v800_v36 = vshra.s32 %v798_v35, 16  ;;  %v799_v40 = vand.u32 65535, %v798_v35 }
 0x25d   : > { %v817_v39 = vcvt.s32.f32 %v815_v38  ;;  %v816_v46 = vcvt.s32.f32 %v814_v43 }
 0x25e   : > { %v802_v37 = vcvt.s32.f32 %v800_v36  ;;  %v801_v42 = vcvt.s32.f32 %v799_v40 }
 0x260   : > { %803 = vmin.xlane.f32.xlu0 %v802_v37 }
 0x264   : > { %818 = vmin.xlane.f32.xlu0 %v817_v39 }
 0x2ed   : > { %v804_v41 = vpop.xlane.xlu0 %803 }
 0x2ee   : > { %vm805_vm14 = vcmp.eq.f32.partialorder %v802_v37, %v804_v41  ;;  %v810_v47 = vcvt.f32.s32 %v804_v41 }
 0x2ef   : > { %v806_v44 = vsel %vm805_vm14, %v801_v42, inf }
 0x2f0   : > { %807 = vmin.xlane.f32.xlu1 %v806_v44  ;;  %v811_v49 = vshll.u32 %v810_v47, 16 }
 0x2f1   : > { %v819_v45 = vpop.xlane.xlu0 %818 }
 0x2f2   : > { %vm820_vm2 = vcmp.eq.f32.partialorder %v817_v39, %v819_v45  ;;  %v825_v50 = vcvt.f32.s32 %v819_v45 }
 0x2f3   : > { %v821_v9 = vsel %vm820_vm2, %v816_v46, inf }
 0x2f4   : > { %822 = vmin.xlane.f32.xlu0 %v821_v9  ;;  %v826_v54 = vshll.u32 %v825_v50, 16 }
 0x37d   : > { %v808_v48 = vpop.xlane.xlu1 %807 }
 0x37e   : > { %v809_v51 = vcvt.f32.s32 %v808_v48 }
 0x380   : > { %v812_v52 = vadd.s32 %v811_v49, %v809_v51 }
 0x381   : > { %v823_v53 = vpop.xlane.xlu0 %822 }
 0x382   : > { %829 = vst.msk [vmem:[%s352_s27] sm:$0xff] %vm828_vm7, %v812_v52  ;;  %v824_v55 = vcvt.f32.s32 %v823_v53 }
 0x384   : > { %v827_v56 = vadd.s32 %v826_v54, %v824_v55 }
 0x386   : > { %830 = vst.msk [vmem:[%s352_s27 + $0x8] sm:$0xff] %vm828_vm7, %v827_v56 }
 0x387 PF: > { %s15_s20 = sadd.s32 1, %s1209_s20   ;;  %s1544_s18 = smov %s1205_s19 }
 0x388   : > { %p12_p5 = scmp.ge.s32.totalorder %s15_s20, 7   ;;  %s1545_s19 = smov %s1547_s21 }
 0x38a   :  { %14 = sbr.rel (!%p12_p5) target bundleno = 2 (0x2), region = 82 }

</bundles_post_ra>
